<compile_context>
chip_gen: v7x
topology: tpu7x:2x2x1
jax: 0.10.0
libtpu: 0.0.40
codegen_flags: <defaults>
</compile_context>

<pallas_src>
import math
import jax
import jax.numpy as jnp
from jax.experimental import pallas as pl
from jax.experimental.pallas import tpu as pltpu


def _round_up(x, m):
    return ((x + m - 1) // m) * m


def _vmem_limit_bytes():
    """Per-generation scoped-VMEM limit: ~3/4 of physical, capped at 100 MiB.

    v7x (64 MiB/TC) -> 48 MiB; v5e/v6e (128 MiB) -> 96 MiB.
    """
    try:
        cap = int(pltpu.get_tpu_info().vmem_capacity_bytes)
    except Exception:
        cap = 128 * 1024 * 1024
    return int(min(cap * 3 // 4, 100 * 1024 * 1024))


def _linear_kernel_noacc(x_ref, w_ref, b_ref, o_ref):
    # Single reduction step: direct dot + bias, no f32 scratch round trip.
    o_ref[...] = (
        jnp.dot(x_ref[...], w_ref[...], preferred_element_type=jnp.float32)
        + b_ref[...]
    ).astype(o_ref.dtype)


def _linear_kernel_acc(x_ref, w_ref, b_ref, o_ref, acc_ref):
    # Generic K-tiled path (only used when W^T does not fit VMEM).
    k = pl.program_id(2)

    @pl.when(k == 0)
    def _():
        acc_ref[...] = jnp.zeros_like(acc_ref)

    acc_ref[...] += jnp.dot(
        x_ref[...], w_ref[...], preferred_element_type=jnp.float32
    )

    @pl.when(k == pl.num_programs(2) - 1)
    def _():
        o_ref[...] = (acc_ref[...] + b_ref[...]).astype(o_ref.dtype)


def dlinear_forward(x, weight, bias, *, compute_dtype=None, tm=None):
    """y = x @ weight.T + bias (torch.nn.Linear semantics).

    x:      (..., input_dim)
    weight: (output_dim, input_dim)   (PyTorch layout)
    bias:   (output_dim,)
    compute_dtype: optional low-precision dtype (e.g. jnp.bfloat16) for the
        MXU operands; accumulation and bias stay f32, output keeps x.dtype.
    """
    out_dtype = x.dtype
    *lead, K = x.shape
    O, K2 = weight.shape
    assert K == K2, "weight in_features mismatch"
    M = int(math.prod(lead)) if lead else 1

    x2 = x.reshape(M, K)
    wt = weight.T                      # one-time (O,K) -> (K,O), outside kernel
    b2 = bias.reshape(1, O).astype(jnp.float32)

    if compute_dtype is not None:
        x2 = x2.astype(compute_dtype)
        wt = wt.astype(compute_dtype)
    c_item = x2.dtype.itemsize
    o_item = jnp.dtype(out_dtype).itemsize
    sub = 16 if c_item < 4 else 8      # bf16 packs 2 rows per sublane

    vmem_limit = _vmem_limit_bytes()
    w_budget = min(8 * 1024 * 1024, vmem_limit // 4)

    weight_bytes = K * O * c_item
    resident = weight_bytes <= w_budget

    if resident:
        # Whole W^T + bias stay VMEM-resident; no padding at all.
        Kp, Np = K, O
        tk, tn = K, O
    else:
        # Fallback for very large K*O: tile K and N. Only the contraction axis
        # needs zero-padding for correctness; the N pad touches weight/bias
        # only (cheap). x is never padded along M.
        tk = min(512, _round_up(K, 128))
        tn = min(256, _round_up(O, 128))
        Kp, Np = _round_up(K, tk), _round_up(O, tn)
        if Kp != K:
            x2 = jnp.pad(x2, ((0, 0), (0, Kp - K)))
        if (Kp, Np) != (K, O):
            wt = jnp.pad(wt, ((0, Kp - K), (0, Np - O)))
        if Np != O:
            b2 = jnp.pad(b2, ((0, 0), (0, Np - O)))

    nkb = Kp // tk
    nnb = Np // tn

    # Largest M tile that fits VMEM (double-buffered x/out tiles + weight +
    # optional f32 accumulator), rounded to the packed-sublane multiple.
    if tm is None:
        w_tile_bytes = Kp * Np * c_item if resident else 2 * tk * tn * c_item
        tm = sub
        for cand in (1024, 512, 256, 128, 64, 32, 16, 8):
            if cand % sub:
                continue
            need = (2 * cand * tk * c_item          # x tiles (double buffered)
                    + 2 * cand * tn * o_item        # out tiles
                    + w_tile_bytes
                    + (0 if nkb == 1 else cand * tn * 4)
                    + 2 * tn * 4)                   # bias
            if need <= vmem_limit // 2:
                tm = cand
                break
    if tm >= M:
        tm = M                                      # full dim; no 8-divisibility needed
    nmb = pl.cdiv(M, tm)
    # v7x megacore: ensure >= 2 parallel M blocks when M is big enough.
    if nmb == 1 and M >= 4 * sub:
        tm = _round_up(pl.cdiv(M, 2), sub)
        nmb = pl.cdiv(M, tm)
    # NOTE: no padding of x along M -- the partial edge block is bounds-masked
    # by Pallas; garbage rows never contaminate valid rows (row-independent matmul).

    if nkb == 1:
        grid = (nmb, nnb)
        in_specs = [
            pl.BlockSpec((tm, tk), lambda i, j: (i, 0)),   # x row panel
            pl.BlockSpec((tk, tn), lambda i, j: (0, j)),   # W^T (resident if nnb==1)
            pl.BlockSpec((1, tn), lambda i, j: (0, j)),    # bias (resident)
        ]
        out_specs = pl.BlockSpec((tm, tn), lambda i, j: (i, j))
        scratch_shapes = []
        kernel = _linear_kernel_noacc
        dimsem = ("parallel", "parallel")
        bytes_accessed = (M * Kp * c_item                  # x read once
                          + Kp * Np * c_item * nmb         # W re-read per M block
                          + Np * 4 * nmb
                          + M * Np * o_item)               # y written once
    else:
        grid = (nmb, nnb, nkb)
        in_specs = [
            pl.BlockSpec((tm, tk), lambda i, j, k: (i, k)),
            pl.BlockSpec((tk, tn), lambda i, j, k: (k, j)),
            pl.BlockSpec((1, tn), lambda i, j, k: (0, j)),
        ]
        out_specs = pl.BlockSpec((tm, tn), lambda i, j, k: (i, j))
        scratch_shapes = [pltpu.VMEM((tm, tn), jnp.float32)]
        kernel = _linear_kernel_acc
        dimsem = ("parallel", "parallel", "arbitrary")
        bytes_accessed = (M * Kp * c_item * nnb            # x re-read per N block
                          + Kp * Np * c_item * nmb         # W re-read per M block
                          + Np * 4 * nmb * nnb
                          + M * Np * o_item)

    cost = pl.CostEstimate(
        flops=2 * M * Kp * Np,
        transcendentals=0,
        bytes_accessed=int(bytes_accessed),
    )

    y = pl.pallas_call(
        kernel,
        out_shape=jax.ShapeDtypeStruct((M, Np), out_dtype),
        grid_spec=pltpu.PrefetchScalarGridSpec(
            num_scalar_prefetch=0,
            grid=grid,
            in_specs=in_specs,
            out_specs=out_specs,
            scratch_shapes=scratch_shapes,
        ),
        compiler_params=pltpu.CompilerParams(
            dimension_semantics=dimsem,
            vmem_limit_bytes=vmem_limit,
        ),
        cost_estimate=cost,
    )(x2, wt, b2)

    if Np != O:
        y = y[:, :O]
    return y.reshape(*lead, O) if lead else y.reshape(O)


def init_dlinear_params(key, input_dim, output_dim, dtype=jnp.float32):
    """Deterministic init mimicking torch.nn.Linear default U(-1/sqrt(fan_in), +)."""
    kw, kb = jax.random.split(key)
    bound = 1.0 / math.sqrt(input_dim)
    weight = jax.random.uniform(
        kw, (output_dim, input_dim), dtype=dtype, minval=-bound, maxval=bound
    )
    bias = jax.random.uniform(
        kb, (output_dim,), dtype=dtype, minval=-bound, maxval=bound
    )
    return weight, bias


if __name__ == "__main__":
    key = jax.random.PRNGKey(0)
    k_x, k_x2, k_p = jax.random.split(key, 3)

    batch, channels = 2, 4            # leading dims flattened into M by the wrapper
    input_dim, output_dim = 32, 16

    x = jax.random.normal(k_x, (batch, channels, input_dim), dtype=jnp.float32)
    weight, bias = init_dlinear_params(k_p, input_dim, output_dim)

    # f32 path (resident-weight fast path, single M block).
    y = dlinear_forward(x, weight, bias)
    jax.block_until_ready(y)
    y_ref = x @ weight.T + bias
    assert y.shape == (batch, channels, output_dim)
    assert jnp.allclose(y, y_ref, atol=1e-5, rtol=1e-5), "f32 mismatch vs reference"

    # Larger-M case: exercises multi-block M grid + partial edge block (no M pad).
    xb = jax.random.normal(k_x2, (5, 40, input_dim), dtype=jnp.float32)
    yb = dlinear_forward(xb, weight, bias)
    jax.block_until_ready(yb)
    yb_ref = xb @ weight.T + bias
    assert jnp.allclose(yb, yb_ref, atol=1e-5, rtol=1e-5), "multi-block mismatch"

    # Optional bf16 operand path (f32 accumulation); looser tolerance expected.
    yl = dlinear_forward(x, weight, bias, compute_dtype=jnp.bfloat16)
    jax.block_until_ready(yl)
    assert jnp.allclose(yl, y_ref, atol=5e-2, rtol=5e-2), "bf16 mismatch vs reference"

    print("KERNEL_OK")
</pallas_src>

<mosaic_0001>
module attributes {stable_mosaic.version = 11 : i64} {
  func.func @_linear_kernel_noacc(%arg0: i32, %arg1: i32, %arg2: memref<8x32xf32, #tpu.memory_space<vmem>>, %arg3: memref<32x16xf32, #tpu.memory_space<vmem>>, %arg4: memref<1x16xf32, #tpu.memory_space<vmem>>, %arg5: memref<8x16xf32, #tpu.memory_space<vmem>>) attributes {dimension_semantics = [#tpu.dimension_semantics<parallel>, #tpu.dimension_semantics<parallel>], iteration_bounds = array<i64: 1, 1>, scalar_prefetch = 0 : i64, scratch_operands = 0 : i64, tpu.core_type = #tpu.core_type<tc>, window_params = [{transform_indices = @transform_0, window_bounds = array<i64: 8, 32>}, {transform_indices = @transform_1, window_bounds = array<i64: 32, 16>}, {transform_indices = @transform_2, window_bounds = array<i64: 1, 16>}, {transform_indices = @transform_3, window_bounds = array<i64: 8, 16>}]} {
    %c0 = arith.constant 0 : index
    %c0_0 = arith.constant 0 : index
    %0 = vector.load %arg2[%c0, %c0_0] : memref<8x32xf32, #tpu.memory_space<vmem>>, vector<8x32xf32>
    %c0_1 = arith.constant 0 : index
    %c0_2 = arith.constant 0 : index
    %1 = vector.load %arg3[%c0_1, %c0_2] : memref<32x16xf32, #tpu.memory_space<vmem>>, vector<32x16xf32>
    %cst = arith.constant dense<0.000000e+00> : vector<8x16xf32>
    %2 = tpu.matmul %0, %1, %cst {dimension_numbers = #tpu.dot_dimension_numbers<[1], [0], [0], [1], [0, 0, 1, 1], [], []>} : vector<8x32xf32>, vector<32x16xf32>, vector<8x16xf32> -> vector<8x16xf32>
    %c0_3 = arith.constant 0 : index
    %c0_4 = arith.constant 0 : index
    %3 = vector.load %arg4[%c0_3, %c0_4] : memref<1x16xf32, #tpu.memory_space<vmem>>, vector<1x16xf32>
    %4 = vector.broadcast %3 : vector<1x16xf32> to vector<8x16xf32>
    %5 = arith.addf %2, %4 : vector<8x16xf32>
    %c0_5 = arith.constant 0 : index
    %c0_6 = arith.constant 0 : index
    %6 = vector.load %arg5[%c0_5, %c0_6] : memref<8x16xf32, #tpu.memory_space<vmem>>, vector<8x16xf32>
    tpu.vector_store %arg5[%c0_5, %c0_6], %5 {strides = array<i32>} : memref<8x16xf32, #tpu.memory_space<vmem>>, vector<8x16xf32>,
    return
  }
  func.func @transform_0(%arg0: i32, %arg1: i32) -> (i32, i32) {
    %c0_i32 = arith.constant 0 : i32
    %c0_i32_0 = arith.constant 0 : i32
    return %arg0, %c0_i32 : i32, i32
  }
  func.func @transform_1(%arg0: i32, %arg1: i32) -> (i32, i32) {
    %c0_i32 = arith.constant 0 : i32
    %c0_i32_0 = arith.constant 0 : i32
    return %c0_i32, %arg1 : i32, i32
  }
  func.func @transform_2(%arg0: i32, %arg1: i32) -> (i32, i32) {
    %c0_i32 = arith.constant 0 : i32
    %c0_i32_0 = arith.constant 0 : i32
    return %c0_i32, %arg1 : i32, i32
  }
  func.func @transform_3(%arg0: i32, %arg1: i32) -> (i32, i32) {
    %c0_i32 = arith.constant 0 : i32
    return %arg0, %arg1 : i32, i32
  }
}

</mosaic_0001>

<bundles_post_ra>
// kernel: tpu_custom_call.1
= control target key start
LH: loop header
LB: loop body
LE: loop exit
PB: predicated region body
PF: predicated region fallthrough
CT: control target
= control target key end

     0   :  { %8 = vsyncpa [#allocation3], 0  ;;  %s360_s0 = inlined_call_operand.hbm [shape: f32[8,32], index: 0, kind: input, shape index: {}]   ;;  %s361_s1 = inlined_call_operand.hbm [shape: f32[32,16], index: 1, kind: input, shape index: {}]   ;;  %s362_s2 = inlined_call_operand.hbm [shape: f32[1,16], index: 2, kind: input, shape index: {}]   ;;  %s363_s3 = inlined_call_operand.hbm [shape: f32[8,16], index: 3, kind: output, shape index: {}]  }
   0x1   :  { %9 = vsyncpa [#allocation6], 0 }
   0x2   :  { %10 = vsyncpa [#allocation4], 0  ;;  %s283_s12 = smov [#allocation5]   ;;  %s189_s16 = scalar_lea.hbm %s361_s1, 512 }
   0x3   :  { %s26_s13 = sshll.u32 %s283_s12, 4  ;;  %p190_p0 = scmp.ne.s32.totalorder %s361_s1, %s189_s16  ;;  %s27_s13 = int_to_ptr.vmem [resolvable:$true] %s26_s13 }
   0x4   :  { %p193_p1 = scmp.lt.u32.totalorder %s189_s16, %s361_s1 }
   0x6   :  { %p195_p2 = pnand %p193_p1, %p190_p0 }
   0x8   :  { %198 = shalt.err (!%p195_p2)
}
   0x9   :  { %s199_s21 = scalar_lea.vmem %s27_s13, 512  ;;  %p204_p4 = scmp.lt.s32.totalorder %s27_s13, %s27_s13 }
   0xa   :  { %p200_p3 = scmp.ne.s32.totalorder %s27_s13, %s199_s21  ;;  %p205_p5 = scmp.lt.s32.totalorder %s199_s21, %s199_s21 }
   0xc   :  { %p206_p6 = por %p205_p5, %p204_p4 }
   0xe   :  { %p207_p7 = pnand %p206_p6, %p200_p3 }
  0x10   :  { %210 = shalt.err (!%p207_p7)
}
  0x11   :  { %s284_s22 = smov 128   ;;  %s285_s23 = smov 8  }
  0x12   :  { %32 = dma.hbm_to_vmem [thread:$0]  %s361_s1, 512, %s27_s13, [#allocation6], %s284_s22, %s284_s22, %s285_s23  }
  0x13   :  { %s286_s26 = smov [#allocation2]   ;;  %s287_s28 = smov [#allocation7]  }
  0x14   :  { %s17_s27 = sshll.u32 %s286_s26, 4  ;;  %s39_s29 = sshll.u32 %s287_s28, 4  ;;  %s18_s27 = int_to_ptr.vmem [resolvable:$true] %s17_s27  ;;  %s40_s29 = int_to_ptr.vmem [resolvable:$true] %s39_s29 }
  0x15   :  { %s211_s5 = scalar_lea.hbm %s360_s0, 128 }
  0x16   :  { %p212_p8 = scmp.ne.s32.totalorder %s360_s0, %s211_s5  ;;  %p215_p9 = scmp.lt.u32.totalorder %s211_s5, %s360_s0 }
  0x18   :  { %p217_p10 = pnand %p215_p9, %p212_p8 }
  0x1a   :  { %220 = shalt.err (!%p217_p10)
}
  0x1b   :  { %s221_s1 = scalar_lea.vmem %s18_s27, 128  ;;  %p226_p12 = scmp.lt.s32.totalorder %s18_s27, %s18_s27 }
  0x1c   :  { %p222_p11 = scmp.ne.s32.totalorder %s18_s27, %s221_s1  ;;  %p227_p13 = scmp.lt.s32.totalorder %s221_s1, %s221_s1 }
  0x1e   :  { %p228_p0 = por %p227_p13, %p226_p12 }
  0x20   :  { %p229_p1 = pnand %p228_p0, %p222_p11 }
  0x22   :  { %232 = shalt.err (!%p229_p1)
}
  0x23   :  { %20 = dma.hbm_to_vmem [thread:$0]  %s360_s0, 128, %s18_s27, [#allocation3]  }
  0x24   :  { %s233_s14 = scalar_lea.hbm %s362_s2, 16 }
  0x25   :  { %p234_p2 = scmp.ne.s32.totalorder %s362_s2, %s233_s14  ;;  %p237_p3 = scmp.lt.u32.totalorder %s233_s14, %s362_s2 }
  0x27   :  { %p239_p4 = pnand %p237_p3, %p234_p2 }
  0x29   :  { %242 = shalt.err (!%p239_p4)
}
  0x2a   :  { %s243_s19 = scalar_lea.vmem %s40_s29, 16  ;;  %s247_s20 = scalar_lea.vmem %s40_s29, 32 }
  0x2b   :  { %p244_p5 = scmp.ne.s32.totalorder %s40_s29, %s243_s19  ;;  %p248_p6 = scmp.lt.s32.totalorder %s40_s29, %s40_s29 }
  0x2c   :  { %p249_p7 = scmp.lt.s32.totalorder %s247_s20, %s243_s19 }
  0x2e   :  { %p250_p8 = por %p249_p7, %p248_p6 }
  0x30   :  { %p251_p9 = pnand %p250_p8, %p244_p5 }
  0x32   :  { %254 = shalt.err (!%p251_p9)
}
  0x33   :  { %42 = dma.hbm_to_vmem [thread:$0]  %s362_s2, 16, %s40_s29, [#allocation6]  }
  0x34   :  { %277 = dma.done.wait [#allocation3], 128  }
  0x35   :  { %278 = vsyncadd [#allocation3], 4294967168 }
  0x36   :  { %279 = dma.done.wait [#allocation6], 528  }
  0x37   :  { %280 = vsyncadd [#allocation6], 4294966768  ;;  %v288_v0 = vmov 0.0|0.0   ;;  %vm289_vm0 = vmmov 0   ;;  %v290_v1 = vmov 0.0   ;;  %v53_v2 = vld [vmem:[#allocation5] sm:$0xff] }
  0x38   :  { %174 = vmatprep.subr.bf16.mxu0 %v288_v0  ;;  %171 = vmatprep.mubr.msk.f32.mxu0 %vm289_vm0, %v290_v1  ;;  %v54_v3 = vld [vmem:[#allocation5 + $0x8] sm:$0xff]  ;;  %v55_v4 = vld [vmem:[#allocation5 + $0x10] sm:$0xff]  ;;  %v56_v6 = vld [vmem:[#allocation5 + $0x18] sm:$0xff]  ;;  %vm64_vm1 = vcmask 261120   ;;  %s291_s2 = smov [#allocation8]   ;;  %vm138_vm2 = vcmask 130048  }
  0x39   :  { %v175_v5 = vpack.c.bf16 %v54_v3, %v53_v2  ;;  %v178_v7 = vpack.c.bf16 %v56_v6, %v55_v4  ;;  %v52_v8 = vld [vmem:[#allocation2] sm:$0xff]  ;;  %v156_v9 = vld [vmem:[#allocation7] ss:$0 sm:$0xff]  ;;  %s146_s22 = sshll.u32 %s291_s2, 4  ;;  %s147_s22 = int_to_ptr.vmem [resolvable:$true] %s146_s22 }
  0x3a   :  { %s255_s23 = scalar_lea.vmem %s147_s22, 128  ;;  %p260_p11 = scmp.lt.s32.totalorder %s147_s22, %s147_s22 }
  0x3b   :  { %176 = vmatpush3.bf16.msra.mxu0 %v175_v5  ;;  %p256_p10 = scmp.ne.s32.totalorder %s147_s22, %s255_s23  ;;  %p261_p12 = scmp.lt.s32.totalorder %s255_s23, %s255_s23 }
  0x3c   :  { %177 = vmatprep.subr.bf16.mxu0 %v288_v0 }
  0x3d   :  { %p262_p13 = por %p261_p12, %p260_p11 }
  0x3f   :  { %179 = vmatpush3.bf16.msra.mxu0 %v178_v7  ;;  %p263_p0 = pnand %p262_p13, %p256_p10 }
  0x42   :  { %172 = vmatmul.mubr.msk.f32.vlgmr.msra.gmra.mrb[0].mxu0 %vm64_vm1, %v52_v8 }
 0x115   :  { %v134_v10 = vpop.f32.mrb[0].mxu0 }
 0x116   :  { %v135_v11 = vadd.f32 %v156_v9, %v134_v10  ;;  %v173_v12 = vpop.f32.mrb[1].mxu0 }
 0x118   :  { %139 = vst.msk [vmem:[#allocation8] sm:$0xff] %vm138_vm2, %v135_v11 }
 0x119   :  { %266 = shalt.err (!%p263_p0)
}
 0x11a   :  { %s267_s26 = scalar_lea.hbm %s363_s3, 128 }
 0x11b   :  { %p268_p1 = scmp.ne.s32.totalorder %s363_s3, %s267_s26  ;;  %p271_p2 = scmp.lt.u32.totalorder %s267_s26, %s363_s3 }
 0x11d   :  { %p273_p3 = pnand %p271_p2, %p268_p1 }
 0x11f   :  { %276 = shalt.err (!%p273_p3)
}
 0x120   :  { %149 = dma.vmem_to_hbm [thread:$0]  %s147_s22, 128, %s363_s3, [#allocation4]  }
 0x121   :  { %281 = dma.done.wait [#allocation4], 128  }
 0x122   :  { %282 = vsyncadd [#allocation4], 4294967168 }
 0x123   :  { %153 = vsyncpa [#allocation3], 1 }
 0x124   :  { %154 = vsyncpa [#allocation6], 1 }
 0x125   :  { %155 = vsyncpa [#allocation4], 1 }

</bundles_post_ra>
